<compile_context>
chip_gen: v7x
topology: tpu7x:2x2x1
jax: 0.10.0
libtpu: 0.0.40
codegen_flags: <defaults>
</compile_context>

<pallas_src>
import functools

import jax
import jax.numpy as jnp
from jax.experimental import pallas as pl
from jax.experimental.pallas import tpu as pltpu

ALPHA = 0.25
GAMMA = 2.0          # used as p*p below (explicit square, no pow)
WEIGHTS = (1.0, 1.0)


def _focal_elementwise(x, t):
    """SimplerFocalLoss per-element loss (fp32), before mean.

    One exp per element: e = exp(-|x|) feeds both
      BCEWithLogits(x, t) = max(x, 0) - x*t + log1p(e)           (stable form)
      sigmoid(x)          = where(x >= 0, 1/(1+e), e/(1+e))      (stable form)
    gamma == 2 powers are explicit multiplies (VPU), not pow (EUP exp+log).
    """
    e = jnp.exp(-jnp.abs(x))
    bce = jnp.maximum(x, 0.0) - x * t + jnp.log1p(e)
    inv = 1.0 / (1.0 + e)
    sig = jnp.where(x >= 0.0, inv, e * inv)
    one_m = 1.0 - sig
    pos = ALPHA * (one_m * one_m) * bce
    neg = (sig * sig) * bce
    return jnp.where(t >= 0.5, pos, neg)


def _improved_focal_kernel(logit_ref, frame_ref, target_ref, out_ref, max_ref,
                           *, t_total, t_tile, mask_tail):
    t = pl.program_id(0)
    nt = pl.num_programs(0)

    # Running max over T, computed in the *native* input dtype (no full-tile
    # f32 upcast of the dominant buffer).
    frames = frame_ref[...]                                   # (B, t_tile, C)
    if mask_tail:
        row = t * t_tile + jax.lax.broadcasted_iota(jnp.int32, frames.shape, 1)
        frames = jnp.where(row < t_total, frames,
                           jnp.array(-jnp.inf, frames.dtype))
    tile_max = jnp.max(frames, axis=1)                        # (B, C)

    @pl.when(t == 0)
    def _():
        max_ref[...] = tile_max

    @pl.when(t > 0)
    def _():
        max_ref[...] = jnp.maximum(max_ref[...], tile_max)

    # Focal math + means + weighted sum: exactly once, at the last T tile.
    @pl.when(t == nt - 1)
    def _():
        logits = logit_ref[...].astype(jnp.float32)           # (B, C)
        targets = target_ref[...].astype(jnp.float32)         # (B, C)
        clip_max = max_ref[...].astype(jnp.float32)           # (B, C)
        normal_loss = jnp.mean(_focal_elementwise(logits, targets))
        auxiliary_loss = jnp.mean(_focal_elementwise(clip_max, targets))
        out_ref[0, 0] = WEIGHTS[0] * normal_loss + WEIGHTS[1] * auxiliary_loss


def _round_t_tile(t_tile, T, sublane):
    """Clamp/round a T-tile to the sublane multiple required by the dtype."""
    t_tile = min(t_tile, T)
    if t_tile < T:
        t_tile = max(sublane, (t_tile // sublane) * sublane)
    return min(t_tile, T)


def _choose_t_tile(T, row_bytes, sublane):
    """Pick the largest T tile such that one frame block is ~4 MiB."""
    target_bytes = 4 << 20               # per buffer; x2 double-buffered ~8 MiB
    rows = max(sublane, target_bytes // max(row_bytes, 1))
    return _round_t_tile(int(rows), T, sublane)


def improved_focal_loss(logits, framewise_output, target, *, t_tile=None):
    """Pallas wrapper. Returns a scalar float32 loss."""
    B, C = logits.shape
    Bt, T, Ct = framewise_output.shape
    assert (B, C) == (Bt, Ct) == tuple(target.shape), "shape mismatch"

    itemsize = framewise_output.dtype.itemsize          # 4 (f32) / 2 (bf16) / 1
    sublane = 8 * max(1, 4 // itemsize)                 # 8 / 16 / 32
    row_bytes = B * C * itemsize

    if t_tile is None:
        t_tile = _choose_t_tile(T, row_bytes, sublane)
    else:
        t_tile = _round_t_tile(int(t_tile), T, sublane)

    nt = pl.cdiv(T, t_tile)
    mask_tail = (T % t_tile) != 0

    frame_block_bytes = B * t_tile * C * itemsize
    # Double-buffered frame block + small (B,C) blocks/scratch + headroom.
    vmem_limit = int(min(32 << 20, max(4 << 20, 4 * frame_block_bytes + (1 << 20))))

    kernel = functools.partial(
        _improved_focal_kernel, t_total=T, t_tile=t_tile, mask_tail=mask_tail)

    out = pl.pallas_call(
        kernel,
        out_shape=jax.ShapeDtypeStruct((1, 1), jnp.float32),
        grid=(nt,),
        in_specs=[
            pl.BlockSpec((B, C), lambda t: (0, 0)),            # logits
            pl.BlockSpec((B, t_tile, C), lambda t: (0, t, 0)),  # framewise
            pl.BlockSpec((B, C), lambda t: (0, 0)),            # target
        ],
        out_specs=pl.BlockSpec(memory_space=pltpu.MemorySpace.SMEM),
        scratch_shapes=[pltpu.VMEM((B, C), framewise_output.dtype)],
        compiler_params=pltpu.CompilerParams(
            dimension_semantics=("arbitrary",),
            vmem_limit_bytes=vmem_limit,
        ),
    )(logits, framewise_output, target)
    return out[0, 0]


def _reference(logits, framewise_output, target):
    """Pure-JAX reference mirroring the PyTorch module."""
    def focal(x, t):
        bce = (jnp.maximum(x, 0.0) - x * t + jnp.log1p(jnp.exp(-jnp.abs(x))))
        p = jax.nn.sigmoid(x)
        loss = jnp.where(t >= 0.5,
                         ALPHA * (1.0 - p) ** GAMMA * bce,
                         p ** GAMMA * bce)
        return jnp.mean(loss)

    target = target.astype(jnp.float32)
    clip_max = jnp.max(framewise_output, axis=1).astype(jnp.float32)
    normal = focal(logits.astype(jnp.float32), target)
    aux = focal(clip_max, target)
    return WEIGHTS[0] * normal + WEIGHTS[1] * aux


if __name__ == "__main__":
    key = jax.random.PRNGKey(0)
    k1, k2, k3 = jax.random.split(key, 3)

    B, T, C = 2, 24, 16
    logits = jax.random.normal(k1, (B, C), dtype=jnp.float32)
    framewise = jax.random.normal(k2, (B, T, C), dtype=jnp.float32)
    # binary-ish targets, converted to float like `target.float()` in torch
    target = (jax.random.uniform(k3, (B, C)) > 0.5).astype(jnp.float32)

    ref = _reference(logits, framewise, target)

    # 1) auto tile (whole T fits in a single block at this small shape)
    loss = jax.block_until_ready(improved_focal_loss(logits, framewise, target))
    assert jnp.allclose(loss, ref, rtol=1e-5, atol=1e-5), (loss, ref)

    # 2) forced small tile -> pipelined multi-step running-max reduction over T
    loss_tiled = jax.block_until_ready(
        improved_focal_loss(logits, framewise, target, t_tile=8))
    assert jnp.allclose(loss_tiled, ref, rtol=1e-5, atol=1e-5), (loss_tiled, ref)

    # 3) bf16 frames/logits + ragged T (exercises native-dtype max and tail mask)
    T2 = 20
    framewise_bf = jax.random.normal(k2, (B, T2, C), dtype=jnp.float32).astype(jnp.bfloat16)
    logits_bf = logits.astype(jnp.bfloat16)
    loss_bf = jax.block_until_ready(
        improved_focal_loss(logits_bf, framewise_bf, target, t_tile=16))
    ref_bf = _reference(logits_bf, framewise_bf, target)
    assert jnp.allclose(loss_bf, ref_bf, rtol=1e-5, atol=1e-5), (loss_bf, ref_bf)

    print("KERNEL_OK")
</pallas_src>

<mosaic_0001>
module attributes {stable_mosaic.version = 11 : i64} {
  func.func @_improved_focal_kernel(%arg0: i32, %arg1: memref<2x16xf32, #tpu.memory_space<vmem>>, %arg2: memref<2x24x16xf32, #tpu.memory_space<vmem>>, %arg3: memref<2x16xf32, #tpu.memory_space<vmem>>, %arg4: memref<1x1xf32, #tpu.memory_space<smem>>, %arg5: memref<2x16xf32, #tpu.memory_space<vmem>>) attributes {dimension_semantics = [#tpu.dimension_semantics<arbitrary>], iteration_bounds = array<i64: 1>, scalar_prefetch = 0 : i64, scratch_operands = 1 : i64, tpu.core_type = #tpu.core_type<tc>, window_params = [{pipeline_mode = #tpu.pipeline_mode<synchronous>, transform_indices = @transform_0, window_bounds = array<i64: 2, 16>}, {transform_indices = @transform_1, window_bounds = array<i64: 2, 24, 16>}, {pipeline_mode = #tpu.pipeline_mode<synchronous>, transform_indices = @transform_2, window_bounds = array<i64: 2, 16>}, {transform_indices = @transform_3, window_bounds = array<i64: 1, 1>}]} {
    %c0 = arith.constant 0 : index
    %c0_0 = arith.constant 0 : index
    %c0_1 = arith.constant 0 : index
    %0 = vector.load %arg2[%c0, %c0_0, %c0_1] : memref<2x24x16xf32, #tpu.memory_space<vmem>>, vector<2x24x16xf32>
    %cst = arith.constant dense<0xFF800000> : vector<2x16xf32>
    %1 = vector.multi_reduction <maximumf>, %0, %cst [1] : vector<2x24x16xf32> to vector<2x16xf32>
    %c0_i32 = arith.constant 0 : i32
    %2 = arith.cmpi eq, %arg0, %c0_i32 : i32
    %3 = arith.extui %2 : i1 to i32
    %c0_i32_2 = arith.constant 0 : i32
    %4 = arith.cmpi ne, %3, %c0_i32_2 : i32
    scf.if %4 {
      %c0_7 = arith.constant 0 : index
      %c0_8 = arith.constant 0 : index
      %11 = vector.load %arg5[%c0_7, %c0_8] : memref<2x16xf32, #tpu.memory_space<vmem>>, vector<2x16xf32>
      tpu.vector_store %arg5[%c0_7, %c0_8], %1 {strides = array<i32>} : memref<2x16xf32, #tpu.memory_space<vmem>>, vector<2x16xf32>,
    } else {
    }
    %c0_i32_3 = arith.constant 0 : i32
    %5 = arith.cmpi sgt, %arg0, %c0_i32_3 : i32
    %6 = arith.extui %5 : i1 to i32
    %c0_i32_4 = arith.constant 0 : i32
    %7 = arith.cmpi ne, %6, %c0_i32_4 : i32
    scf.if %7 {
      %c0_7 = arith.constant 0 : index
      %c0_8 = arith.constant 0 : index
      %11 = vector.load %arg5[%c0_7, %c0_8] : memref<2x16xf32, #tpu.memory_space<vmem>>, vector<2x16xf32>
      %12 = arith.maximumf %11, %1 : vector<2x16xf32>
      %c0_9 = arith.constant 0 : index
      %c0_10 = arith.constant 0 : index
      %13 = vector.load %arg5[%c0_9, %c0_10] : memref<2x16xf32, #tpu.memory_space<vmem>>, vector<2x16xf32>
      tpu.vector_store %arg5[%c0_9, %c0_10], %12 {strides = array<i32>} : memref<2x16xf32, #tpu.memory_space<vmem>>, vector<2x16xf32>,
    } else {
    }
    %c0_i32_5 = arith.constant 0 : i32
    %8 = arith.cmpi eq, %arg0, %c0_i32_5 : i32
    %9 = arith.extui %8 : i1 to i32
    %c0_i32_6 = arith.constant 0 : i32
    %10 = arith.cmpi ne, %9, %c0_i32_6 : i32
    scf.if %10 {
      %c0_7 = arith.constant 0 : index
      %c0_8 = arith.constant 0 : index
      %11 = vector.load %arg1[%c0_7, %c0_8] : memref<2x16xf32, #tpu.memory_space<vmem>>, vector<2x16xf32>
      %c0_9 = arith.constant 0 : index
      %c0_10 = arith.constant 0 : index
      %12 = vector.load %arg3[%c0_9, %c0_10] : memref<2x16xf32, #tpu.memory_space<vmem>>, vector<2x16xf32>
      %c0_11 = arith.constant 0 : index
      %c0_12 = arith.constant 0 : index
      %13 = vector.load %arg5[%c0_11, %c0_12] : memref<2x16xf32, #tpu.memory_space<vmem>>, vector<2x16xf32>
      %14 = math.absf %11 : vector<2x16xf32>
      %cst_13 = arith.constant 0.000000e+00 : f32
      %15 = vector.broadcast %cst_13 : f32 to vector<2x16xf32>
      %16 = arith.subf %15, %14 : vector<2x16xf32>
      %17 = math.exp %16 : vector<2x16xf32>
      %cst_14 = arith.constant 0.000000e+00 : f32
      %18 = vector.broadcast %cst_14 : f32 to vector<2x16xf32>
      %19 = arith.maximumf %11, %18 : vector<2x16xf32>
      %20 = arith.mulf %11, %12 : vector<2x16xf32>
      %21 = arith.subf %19, %20 : vector<2x16xf32>
      %22 = math.log1p %17 : vector<2x16xf32>
      %23 = arith.addf %21, %22 : vector<2x16xf32>
      %cst_15 = arith.constant 1.000000e+00 : f32
      %24 = vector.broadcast %cst_15 : f32 to vector<2x16xf32>
      %25 = arith.addf %24, %17 : vector<2x16xf32>
      %cst_16 = arith.constant 1.000000e+00 : f32
      %26 = vector.broadcast %cst_16 : f32 to vector<2x16xf32>
      %27 = arith.divf %26, %25 : vector<2x16xf32>
      %cst_17 = arith.constant 0.000000e+00 : f32
      %28 = vector.broadcast %cst_17 : f32 to vector<2x16xf32>
      %29 = arith.cmpf oge, %11, %28 : vector<2x16xf32>
      %30 = arith.mulf %17, %27 : vector<2x16xf32>
      %31 = arith.select %29, %27, %30 : vector<2x16xi1>, vector<2x16xf32>
      %cst_18 = arith.constant 1.000000e+00 : f32
      %32 = vector.broadcast %cst_18 : f32 to vector<2x16xf32>
      %33 = arith.subf %32, %31 : vector<2x16xf32>
      %34 = arith.mulf %33, %33 : vector<2x16xf32>
      %cst_19 = arith.constant 2.500000e-01 : f32
      %35 = vector.broadcast %cst_19 : f32 to vector<2x16xf32>
      %36 = arith.mulf %35, %34 : vector<2x16xf32>
      %37 = arith.mulf %36, %23 : vector<2x16xf32>
      %38 = arith.mulf %31, %31 : vector<2x16xf32>
      %39 = arith.mulf %38, %23 : vector<2x16xf32>
      %cst_20 = arith.constant 5.000000e-01 : f32
      %40 = vector.broadcast %cst_20 : f32 to vector<2x16xf32>
      %41 = arith.cmpf oge, %12, %40 : vector<2x16xf32>
      %42 = arith.select %41, %37, %39 : vector<2x16xi1>, vector<2x16xf32>
      %43 = vector.shape_cast %42 : vector<2x16xf32> to vector<1x2x16xf32>
      %cst_21 = arith.constant dense<0.000000e+00> : vector<1xf32>
      %44 = vector.multi_reduction <add>, %43, %cst_21 [1, 2] : vector<1x2x16xf32> to vector<1xf32>
      %45 = vector.shape_cast %44 : vector<1xf32> to vector<1x1x1xf32>
      %46 = vector.extract %45[0, 0, 0] : f32 from vector<1x1x1xf32>
      %cst_22 = arith.constant 3.200000e+01 : f32
      %47 = arith.divf %46, %cst_22 : f32
      %48 = math.absf %13 : vector<2x16xf32>
      %cst_23 = arith.constant 0.000000e+00 : f32
      %49 = vector.broadcast %cst_23 : f32 to vector<2x16xf32>
      %50 = arith.subf %49, %48 : vector<2x16xf32>
      %51 = math.exp %50 : vector<2x16xf32>
      %cst_24 = arith.constant 0.000000e+00 : f32
      %52 = vector.broadcast %cst_24 : f32 to vector<2x16xf32>
      %53 = arith.maximumf %13, %52 : vector<2x16xf32>
      %54 = arith.mulf %13, %12 : vector<2x16xf32>
      %55 = arith.subf %53, %54 : vector<2x16xf32>
      %56 = math.log1p %51 : vector<2x16xf32>
      %57 = arith.addf %55, %56 : vector<2x16xf32>
      %cst_25 = arith.constant 1.000000e+00 : f32
      %58 = vector.broadcast %cst_25 : f32 to vector<2x16xf32>
      %59 = arith.addf %58, %51 : vector<2x16xf32>
      %cst_26 = arith.constant 1.000000e+00 : f32
      %60 = vector.broadcast %cst_26 : f32 to vector<2x16xf32>
      %61 = arith.divf %60, %59 : vector<2x16xf32>
      %cst_27 = arith.constant 0.000000e+00 : f32
      %62 = vector.broadcast %cst_27 : f32 to vector<2x16xf32>
      %63 = arith.cmpf oge, %13, %62 : vector<2x16xf32>
      %64 = arith.mulf %51, %61 : vector<2x16xf32>
      %65 = arith.select %63, %61, %64 : vector<2x16xi1>, vector<2x16xf32>
      %cst_28 = arith.constant 1.000000e+00 : f32
      %66 = vector.broadcast %cst_28 : f32 to vector<2x16xf32>
      %67 = arith.subf %66, %65 : vector<2x16xf32>
      %68 = arith.mulf %67, %67 : vector<2x16xf32>
      %cst_29 = arith.constant 2.500000e-01 : f32
      %69 = vector.broadcast %cst_29 : f32 to vector<2x16xf32>
      %70 = arith.mulf %69, %68 : vector<2x16xf32>
      %71 = arith.mulf %70, %57 : vector<2x16xf32>
      %72 = arith.mulf %65, %65 : vector<2x16xf32>
      %73 = arith.mulf %72, %57 : vector<2x16xf32>
      %cst_30 = arith.constant 5.000000e-01 : f32
      %74 = vector.broadcast %cst_30 : f32 to vector<2x16xf32>
      %75 = arith.cmpf oge, %12, %74 : vector<2x16xf32>
      %76 = arith.select %75, %71, %73 : vector<2x16xi1>, vector<2x16xf32>
      %77 = vector.shape_cast %76 : vector<2x16xf32> to vector<1x2x16xf32>
      %cst_31 = arith.constant dense<0.000000e+00> : vector<1xf32>
      %78 = vector.multi_reduction <add>, %77, %cst_31 [1, 2] : vector<1x2x16xf32> to vector<1xf32>
      %79 = vector.shape_cast %78 : vector<1xf32> to vector<1x1x1xf32>
      %80 = vector.extract %79[0, 0, 0] : f32 from vector<1x1x1xf32>
      %cst_32 = arith.constant 3.200000e+01 : f32
      %81 = arith.divf %80, %cst_32 : f32
      %cst_33 = arith.constant 1.000000e+00 : f32
      %82 = arith.mulf %cst_33, %47 : f32
      %cst_34 = arith.constant 1.000000e+00 : f32
      %83 = arith.mulf %cst_34, %81 : f32
      %84 = arith.addf %82, %83 : f32
      %c0_35 = arith.constant 0 : index
      %c0_36 = arith.constant 0 : index
      %85 = memref.load %arg4[%c0_35, %c0_36] : memref<1x1xf32, #tpu.memory_space<smem>>
      memref.store %84, %arg4[%c0_35, %c0_36] : memref<1x1xf32, #tpu.memory_space<smem>>
    } else {
    }
    return
  }
  func.func @transform_0(%arg0: i32) -> (i32, i32) {
    %c0_i32 = arith.constant 0 : i32
    %c0_i32_0 = arith.constant 0 : i32
    %c0_i32_1 = arith.constant 0 : i32
    return %c0_i32, %c0_i32_0 : i32, i32
  }
  func.func @transform_1(%arg0: i32) -> (i32, i32, i32) {
    %c0_i32 = arith.constant 0 : i32
    %c0_i32_0 = arith.constant 0 : i32
    %c0_i32_1 = arith.constant 0 : i32
    return %c0_i32, %arg0, %c0_i32_0 : i32, i32, i32
  }
  func.func @transform_2(%arg0: i32) -> (i32, i32) {
    %c0_i32 = arith.constant 0 : i32
    %c0_i32_0 = arith.constant 0 : i32
    %c0_i32_1 = arith.constant 0 : i32
    return %c0_i32, %c0_i32_0 : i32, i32
  }
  func.func @transform_3(%arg0: i32) -> (i32, i32) {
    %c0_i32 = arith.constant 0 : i32
    %c0_i32_0 = arith.constant 0 : i32
    %c0_i32_1 = arith.constant 0 : i32
    return %c0_i32, %c0_i32_0 : i32, i32
  }
}

</mosaic_0001>

<bundles_post_ra>
// kernel: tpu_custom_call.1
= control target key start
LH: loop header
LB: loop body
LE: loop exit
PB: predicated region body
PF: predicated region fallthrough
CT: control target
= control target key end

     0   :  { %vm21_vm0 = vcmask 130048   ;;  %s275_s0 = inlined_call_operand.vmem [shape: f32[2,16], index: 0, kind: input, shape index: {}]   ;;  %s276_s1 = inlined_call_operand.vmem [shape: f32[2,24,16], index: 1, kind: input, shape index: {}]   ;;  %s277_s2 = inlined_call_operand.vmem [shape: f32[2,16], index: 2, kind: input, shape index: {}]   ;;  %s278_s3 = inlined_call_operand.hbm [shape: f32[1,1], index: 3, kind: output, shape index: {}]  }
   0x1   :  { %v231_v0 = vld [vmem:[%s275_s0] sm:$0x3]  ;;  %v16_v3 = vld [vmem:[%s276_s1 + $0x8] sm:$0xff]  ;;  %v17_v4 = vld [vmem:[%s276_s1 + $0x10] sm:$0xff] }
   0x2   :  { %v15_v1 = vld [vmem:[%s276_s1] sm:$0xff]  ;;  %v74_v2 = vand.u32 2147483647, %v231_v0  ;;  %v18_v5 = vld [vmem:[%s276_s1 + $0x18] sm:$0xff]  ;;  %v20_v7 = vld [vmem:[%s276_s1 + $0x28] sm:$0xff]  ;;  %v23_v10 = vsel %vm21_vm0, %v16_v3, -inf }
   0x3   :  { %v19_v6 = vld [vmem:[%s276_s1 + $0x20] sm:$0xff]  ;;  %v22_v9 = vsel %vm21_vm0, %v15_v1, -inf }
   0x4   :  { %v75_v8 = vsub.f32 0.0, %v74_v2 }
   0x5   :  { %8 = vsyncpa [#allocation4], 0  ;;  %v24_v11 = vsel %vm21_vm0, %v17_v4, -inf  ;;  %v33_v12 = vsel %vm21_vm0, %v18_v5, -inf  ;;  %v34_v13 = vsel %vm21_vm0, %v19_v6, -inf  ;;  %v35_v14 = vsel %vm21_vm0, %v20_v7, -inf }
   0x6   :  { %v76_v15 = vmul.f32 1.442695, %v75_v8  ;;  %v25_v16 = vmax.f32 %v22_v9, %v24_v11  ;;  %v36_v17 = vmax.f32 %v33_v12, %v35_v14  ;;  %vm50_vm1 = vcmask 1041409   ;;  %v72_v36 = vld [vmem:[%s277_s2] sm:$0x3]  ;;  %s195_s5 = scalar_lea.hbm %s278_s3, 16 }
   0x7   :  { %vm53_vm2 = vcmask 123904   ;;  %v78_v39 = vmax.f32 %v231_v0, 0.0  ;;  %v79_v40 = vmul.f32 %v72_v36, %v231_v0  ;;  %vm94_vm4 = vcmp.ge.f32.partialorder %v231_v0, 0.0  ;;  %p196_p0 = scmp.ne.s32.totalorder %s278_s3, %s195_s5  ;;  %p199_p1 = scmp.lt.u32.totalorder %s195_s5, %s278_s3 }
   0x8   :  { %183 = vpow2.f32 %v76_v15  ;;  %v26_v18 = vmax.f32 %v25_v16, %v23_v10  ;;  %v37_v19 = vmax.f32 %v36_v17, %v34_v13  ;;  %vm103_vm5 = vcmp.ge.f32.partialorder %v72_v36, 0.5 }
   0x9   :  { %v80_v46 = vsub.f32 %v78_v39, %v79_v40  ;;  %p201_p2 = pnand %p199_p1, %p196_p0 }
   0xa   :  { %v27_v20 = vrot.slane %v26_v18, 4  ;;  %v38_v21 = vrot.slane %v37_v19, 4 }
   0xc   :  { %v28_v22 = vmax.f32 %v26_v18, %v27_v20  ;;  %v39_v23 = vmax.f32 %v37_v19, %v38_v21 }
   0xe   :  { %v29_v24 = vrot.slane %v28_v22, 2  ;;  %v40_v25 = vrot.slane %v39_v23, 2 }
  0x10   :  { %v30_v26 = vmax.f32 %v28_v22, %v29_v24  ;;  %v41_v27 = vmax.f32 %v39_v23, %v40_v25 }
  0x12   :  { %v184_v28 = vpop.eup %183  ;;  %v31_v29 = vrot.slane %v30_v26, 1  ;;  %v42_v30 = vrot.slane %v41_v27, 1 }
  0x13   :  { %v81_v31 = vadd.f32 1.0, %v184_v28  ;;  %v84_v34 = vmul.f32 -0.5, %v184_v28  ;;  %v87_v38 = vand.u32 2147483647, %v184_v28 }
  0x14   :  { %v32_v32 = vmax.f32 %v30_v26, %v31_v29  ;;  %v43_v33 = vmax.f32 %v41_v27, %v42_v30 }
  0x15   :  { %185 = vlog2.f32 %v81_v31  ;;  %v85_v37 = vadd.f32 1.0, %v84_v34  ;;  %vm88_vm3 = vcmp.lt.f32.partialorder %v87_v38, 0.0004427343 }
  0x16   :  { %187 = vrcp.f32 %v81_v31  ;;  %v51_v35 = vsel %vm50_vm1, %v43_v33, %v32_v32 }
  0x17   :  { %54 = vst.msk [vmem:[#allocation2] sm:$0x3] %vm53_vm2, %v51_v35  ;;  %v86_v41 = vmul.f32 %v184_v28, %v85_v37 }
  0x1e   :  { %v73_v42 = vld [vmem:[#allocation2] sm:$0x3] }
  0x1f   :  { %v186_v43 = vpop.eup %185  ;;  %v119_v44 = vand.u32 2147483647, %v73_v42  ;;  %v123_v3 = vmax.f32 %v73_v42, 0.0  ;;  %v124_v4 = vmul.f32 %v73_v42, %v72_v36  ;;  %vm139_vm7 = vcmp.ge.f32.partialorder %v73_v42, 0.0 }
  0x20   :  { %v188_v45 = vpop.eup %187  ;;  %v83_v47 = vmul.f32 0.6931472, %v186_v43 }
  0x21   :  { %v95_v48 = vmul.f32 %v188_v45, %v184_v28  ;;  %v120_v49 = vsub.f32 0.0, %v119_v44  ;;  %v125_v8 = vsub.f32 %v123_v3, %v124_v4 }
  0x22   :  { %v89_v50 = vsel %vm88_vm3, %v86_v41, %v83_v47 }
  0x23   :  { %v96_v51 = vsel %vm94_vm4, %v188_v45, %v95_v48  ;;  %v121_v52 = vmul.f32 1.442695, %v120_v49  ;;  %v90_v53 = vadd.f32 %v89_v50, %v80_v46 }
  0x24   :  { %v97_v54 = vsub.f32 1.0, %v96_v51  ;;  %v101_v55 = vmul.f32 %v96_v51, %v96_v51 }
  0x25   :  { %189 = vpow2.f32 %v121_v52 }
  0x26   :  { %v98_v56 = vmul.f32 %v97_v54, %v97_v54  ;;  %v102_v58 = vmul.f32 %v101_v55, %v90_v53 }
  0x28   :  { %v99_v57 = vmul.f32 0.25, %v98_v56 }
  0x2a   :  { %v100_v59 = vmul.f32 %v99_v57, %v90_v53 }
  0x2c   :  { %v104_v60 = vsel %vm103_vm5, %v100_v59, %v102_v58 }
  0x2d   :  { %v106_v61 = vsel %vm53_vm2, %v104_v60, 0.0 }
  0x2e   :  { %107 = vadd.xlane.f32.xlu0 %v106_v61 }
  0x2f   :  { %v190_v62 = vpop.eup %189 }
  0x30   :  { %v126_v63 = vadd.f32 1.0, %v190_v62  ;;  %v129_v0 = vmul.f32 -0.5, %v190_v62  ;;  %v132_v2 = vand.u32 2147483647, %v190_v62 }
  0x32   :  { %191 = vlog2.f32 %v126_v63  ;;  %v130_v1 = vadd.f32 1.0, %v129_v0  ;;  %vm133_vm6 = vcmp.lt.f32.partialorder %v132_v2, 0.0004427343 }
  0x33   :  { %193 = vrcp.f32 %v126_v63 }
  0x34   :  { %v131_v5 = vmul.f32 %v190_v62, %v130_v1 }
  0x3c   :  { %v192_v6 = vpop.eup %191 }
  0x3d   :  { %v194_v7 = vpop.eup %193  ;;  %v128_v9 = vmul.f32 0.6931472, %v192_v6 }
  0x3e   :  { %v140_v10 = vmul.f32 %v194_v7, %v190_v62 }
  0x3f   :  { %v134_v11 = vsel %vm133_vm6, %v131_v5, %v128_v9 }
  0x40   :  { %v141_v12 = vsel %vm139_vm7, %v194_v7, %v140_v10  ;;  %v135_v13 = vadd.f32 %v134_v11, %v125_v8 }
  0x41   :  { %v142_v14 = vsub.f32 1.0, %v141_v12  ;;  %v146_v15 = vmul.f32 %v141_v12, %v141_v12 }
  0x43   :  { %v143_v16 = vmul.f32 %v142_v14, %v142_v14  ;;  %v147_v18 = vmul.f32 %v146_v15, %v135_v13 }
  0x45   :  { %v144_v17 = vmul.f32 0.25, %v143_v16 }
  0x47   :  { %v145_v19 = vmul.f32 %v144_v17, %v135_v13 }
  0x49   :  { %v148_v20 = vsel %vm103_vm5, %v145_v19, %v147_v18 }
  0x4a   :  { %v149_v21 = vsel %vm53_vm2, %v148_v20, 0.0 }
  0x4b   :  { %150 = vadd.xlane.f32.xlu0 %v149_v21 }
  0xbb   :  { %v108_v22 = vpop.xlane.xlu0 %107 }
  0xbc   :  { %v109_v23 = vrot.slane %v108_v22, 4 }
  0xbe   :  { %v110_v24 = vadd.f32 %v109_v23, %v108_v22 }
  0xc0   :  { %v111_v25 = vrot.slane %v110_v24, 2 }
  0xc2   :  { %v112_v26 = vadd.f32 %v111_v25, %v110_v24 }
  0xc4   :  { %v113_v27 = vrot.slane %v112_v26, 1 }
  0xc6   :  { %v114_v28 = vadd.f32 %v113_v27, %v112_v26 }
  0xc8   :  { %178 = vpush %v114_v28 }
  0xd8   :  { %v151_v29 = vpop.xlane.xlu0 %150 }
  0xd9   :  { %v152_v30 = vrot.slane %v151_v29, 4 }
  0xdb   :  { %v153_v31 = vadd.f32 %v152_v30, %v151_v29 }
  0xdd   :  { %v154_v32 = vrot.slane %v153_v31, 2 }
  0xdf   :  { %v155_v33 = vadd.f32 %v154_v32, %v153_v31 }
  0xe1   :  { %v156_v34 = vrot.slane %v155_v33, 1 }
  0xe3   :  { %v157_v35 = vadd.f32 %v156_v34, %v155_v33 }
  0xe5   :  { %180 = vpush %v157_v35 }
  0xf9   :  { %s179_s2 = spop %178 }
  0xfa   :  { %s118_s26 = smul.f32 0.03125, %s179_s2 }
 0x116   :  { %s181_s27 = spop %180 }
 0x117   :  { %s161_s28 = smul.f32 0.03125, %s181_s27 }
 0x119   :  { %s162_s29 = sadd.f32 %s161_s28, %s118_s26 }
 0x11b   :  { %164 = sst [smem:[#allocation3]] %s162_s29 }
 0x11c   :  { %204 = shalt.err (!%p201_p2)
}
 0x11d   :  { %s207_s10 = smov [#allocation3]  }
 0x11e   :  { %172 = dma.smem_to_hbm %s207_s10, 16, %s278_s3, [#allocation4]  }
 0x11f   :  { %205 = dma.done.wait [#allocation4], 16  }
 0x120   :  { %206 = vsyncadd [#allocation4], 4294967280 }
 0x121   :  { %176 = sfence }
 0x122   :  { %177 = vsyncpa [#allocation4], 1 }

</bundles_post_ra>
